<compile_context>
chip_gen: v7x
topology: tpu7x:2x2x1
jax: 0.10.0
libtpu: 0.0.40
codegen_flags: <defaults>
</compile_context>

<pallas_src>
import functools

import numpy as np
import jax
import jax.numpy as jnp
from jax.experimental import pallas as pl
from jax.experimental.pallas import tpu as pltpu


# ----------------------------------------------------------------------------
# Device-aware sizing helpers
# ----------------------------------------------------------------------------

def _round_up(x, m):
    return -(-x // m) * m


@functools.lru_cache(maxsize=None)
def _vmem_budget_bytes():
    """~65% of physical VMEM (fallback: assume a 64 MiB part)."""
    try:
        cap = int(pltpu.get_tpu_info().vmem_capacity_bytes)
    except Exception:
        cap = 64 * 1024 * 1024
    return min(int(0.65 * cap), 96 * 1024 * 1024)


@functools.lru_cache(maxsize=None)
def _single_buffered_weight_supported():
    """Probe (once) whether pl.Buffered(1) single-buffering lowers and runs."""
    try:
        def k(x_ref, o_ref):
            o_ref[...] = x_ref[...] + 1.0

        f = pl.pallas_call(
            k,
            out_shape=jax.ShapeDtypeStruct((8, 128), jnp.float32),
            grid=(1,),
            in_specs=[pl.BlockSpec((8, 128), lambda i: (0, 0),
                                   pipeline_mode=pl.Buffered(1))],
            out_specs=pl.BlockSpec((8, 128), lambda i: (0, 0)),
        )
        x = jnp.arange(8 * 128, dtype=jnp.float32).reshape(8, 128)
        y = jax.block_until_ready(f(x))
        return bool(jnp.allclose(y, x + 1.0))
    except Exception:
        return False


def _largest_divisor_fitting(n, unit_cost, cap):
    """Largest divisor d of n with d * unit_cost <= cap (>= 1)."""
    best = 1
    for d in range(1, n + 1):
        if n % d == 0 and d * unit_cost <= cap:
            best = d
    return best


# ----------------------------------------------------------------------------
# Markov loss mask (halo ring only)
# ----------------------------------------------------------------------------

def markov_rand_chain(key, batch_shape, length, p11, p22):
    """Gilbert-Elliott binary chain, serial only along `length`, batched."""
    nb = int(np.prod(batch_shape)) if batch_shape else 1
    u = jax.random.uniform(key, (length, nb), dtype=jnp.float32)

    def step(state, ui):
        keep = jnp.where(state == 1, ui < p11, ui >= p22)
        new = keep.astype(jnp.int32)
        return new, new

    _, seq = jax.lax.scan(step, jnp.ones((nb,), jnp.int32), u)  # (length, nb)
    return jnp.transpose(seq).reshape(*batch_shape, length).astype(jnp.float32)


def build_pieces_masked(x, key, p11, p22, pieces):
    """Split NCHW input into halo-padded pieces; mask only the 1-pixel halo.

    Returns (P, N, C, Hp, Wp) f32.  The interior is left untouched, which is
    equivalent to the reference's mask-then-restore-interior.
    """
    N, C, H, W = x.shape
    p0, p1 = pieces
    li, lj = H // p0, W // p1
    Hp, Wp = li + 2, lj + 2
    P = p0 * p1
    xpad = jnp.pad(x, ((0, 0), (0, 0), (1, 1), (1, 1)))
    xs = [xpad[:, :, i * li:i * li + Hp, j * lj:j * lj + Wp]
          for i in range(p0) for j in range(p1)]
    xp = jnp.stack(xs)                                         # (P, N, C, Hp, Wp)

    # Halo ring chain: serial depth 2*(Hp+Wp)-4 instead of Hp*Wp.
    L = 2 * Wp + 2 * (Hp - 2)
    ring = markov_rand_chain(key, (P, N, C), L, p11, p22)      # (P, N, C, L)
    top = ring[..., 0:Wp]
    bot = ring[..., Wp:2 * Wp]
    left = ring[..., 2 * Wp:2 * Wp + (Hp - 2)]
    right = ring[..., 2 * Wp + (Hp - 2):L]
    xp = xp.at[:, :, :, 0, :].multiply(top)
    xp = xp.at[:, :, :, Hp - 1, :].multiply(bot)
    xp = xp.at[:, :, :, 1:Hp - 1, 0].multiply(left)
    xp = xp.at[:, :, :, 1:Hp - 1, Wp - 1].multiply(right)
    return xp


# ----------------------------------------------------------------------------
# Pallas kernel
# ----------------------------------------------------------------------------

def _conv_piece_kernel(x_ref, w_ref, o_ref, *, li, lj, cin, bh, prepacked):
    # prepacked: x_ref (n_blk, li, lj, Kpad)     bf16 (host-side im2col, K>=128)
    # else     : x_ref (n_blk, Hp, Wp, C)        bf16 (channels-last piece)
    # w_ref    : (Kin, cout_pad)                 bf16, flat HWIO weight, resident
    # o_ref    : (n_blk, li, lj, cout_pad)       bf16
    n_blk, _, _, cout_pad = o_ref.shape
    kin = w_ref.shape[0]
    n_bands = li // bh

    for band in range(n_bands):          # static band loop bounds the working set
        r0 = band * bh
        if prepacked:
            lhs = x_ref[:, r0:r0 + bh, :, :].reshape(n_blk * bh * lj, kin)
            acc = jnp.dot(lhs, w_ref[...], preferred_element_type=jnp.float32)
        else:
            acc = None
            for dy in range(3):
                for dx in range(3):
                    tap = x_ref[:, r0 + dy:r0 + dy + bh, dx:dx + lj, :]
                    lhs = tap.reshape(n_blk * bh * lj, cin)
                    k0 = (dy * 3 + dx) * cin
                    d = jnp.dot(lhs, w_ref[k0:k0 + cin, :],
                                preferred_element_type=jnp.float32)
                    acc = d if acc is None else acc + d
        o_ref[:, r0:r0 + bh, :, :] = (
            acc.reshape(n_blk, bh, lj, cout_pad).astype(o_ref.dtype))


def lossy_conv2d_pallas(xm, weight):
    """xm: masked pieces (P, N, C, Hp, Wp) f32; weight: (Cout, Cin, 3, 3).

    Returns (P, N, li, lj, cout_pad) bf16 (padded channels; caller slices).
    """
    P, N, C, Hp, Wp = xm.shape
    Cout, Cin, KH, KW = weight.shape
    assert (Cin, KH, KW) == (C, 3, 3)
    li, lj = Hp - 2, Wp - 2
    cout_pad = _round_up(Cout, 128)

    budget = _vmem_budget_bytes()
    rows_target = 1024 if budget <= 48 * 1024 * 1024 else 4096  # v7x vs v5e/v6e

    # Flat HWIO weight (tap-major, channel-minor), lane-padded output dim.
    w_flat = jnp.transpose(weight, (2, 3, 1, 0)).reshape(9 * C, Cout)

    prepacked = C <= 16  # host-side im2col only for tiny-Cin layers (VGG conv1)
    if prepacked:
        kin = _round_up(9 * C, 128)
        x_cl = jnp.transpose(xm, (0, 1, 3, 4, 2))               # (P,N,Hp,Wp,C)
        taps = [x_cl[:, :, dy:dy + li, dx:dx + lj, :]
                for dy in range(3) for dx in range(3)]
        x_in = jnp.concatenate(taps, axis=-1)                    # (P,N,li,lj,9C)
        x_in = jnp.pad(x_in, [(0, 0)] * 4 + [(0, kin - 9 * C)]).astype(jnp.bfloat16)
        in_block_tail = (li, lj, kin)
        w_pad_rows = kin - 9 * C
    else:
        x_in = jnp.transpose(xm, (0, 1, 3, 4, 2)).astype(jnp.bfloat16)  # (P,N,Hp,Wp,C)
        in_block_tail = (Hp, Wp, C)
        w_pad_rows = 0

    w_flat = jnp.pad(w_flat, ((0, w_pad_rows), (0, cout_pad - Cout))).astype(jnp.bfloat16)

    # Batch tile: largest divisor of N whose double-buffered bf16 in+out blocks
    # stay under half the VMEM budget.
    per_sample = 2 * 2 * (int(np.prod(in_block_tail)) + li * lj * cout_pad)
    n_blk = _largest_divisor_fitting(N, per_sample, budget // 2)
    nb_tiles = N // n_blk
    # Keep >=2 grid steps so a 2-TC part (v7x) can split the parallel grid.
    if P * nb_tiles < 2 and N >= 2:
        for d in range(n_blk - 1, 0, -1):
            if N % d == 0 and (N // d) >= 2:
                n_blk, nb_tiles = d, N // d
                break

    # Spatial band: rows per inner matmul so M = n_blk*bh*lj stays moderate.
    bh = _largest_divisor_fitting(li, n_blk * lj, rows_target)

    kern = functools.partial(_conv_piece_kernel, li=li, lj=lj, cin=C, bh=bh,
                             prepacked=prepacked)

    w_spec_kw = {}
    if _single_buffered_weight_supported():
        w_spec_kw["pipeline_mode"] = pl.Buffered(1)   # resident weight, 1 buffer

    out = pl.pallas_call(
        kern,
        out_shape=jax.ShapeDtypeStruct((P, N, li, lj, cout_pad), jnp.bfloat16),
        grid=(P, nb_tiles),
        in_specs=[
            pl.BlockSpec((None, n_blk) + in_block_tail,
                         lambda p, b: (p, b, 0, 0, 0)),
            pl.BlockSpec(w_flat.shape, lambda p, b: (0, 0), **w_spec_kw),
        ],
        out_specs=pl.BlockSpec((None, n_blk, li, lj, cout_pad),
                               lambda p, b: (p, b, 0, 0, 0)),
        compiler_params=pltpu.CompilerParams(
            dimension_semantics=("parallel", "parallel"),
            vmem_limit_bytes=budget,
        ),
    )(x_in, w_flat)
    return out


def assemble(out, pieces, cout):
    """(P, N, li, lj, cout_pad) -> (N, cout, H, W) f32, matching torch.cat order.

    The padded-channel slice is folded into the re-assembly transpose so it
    fuses into a single XLA copy.
    """
    P, N, li, lj, _ = out.shape
    p0, p1 = pieces
    o = out[..., :cout].reshape(p0, p1, N, li, lj, cout)
    o = jnp.transpose(o, (2, 5, 0, 3, 1, 4))          # (N, cout, p0, li, p1, lj)
    return o.reshape(N, cout, p0 * li, p1 * lj).astype(jnp.float32)


def lossy_conv2d_new_forward(x, weight, key, p11=0.99, p22=0.03, pieces=(2, 2)):
    xm = build_pieces_masked(x, key, p11, p22, pieces)
    out = lossy_conv2d_pallas(xm, weight)
    return assemble(out, pieces, weight.shape[0])


# ----------------------------------------------------------------------------
# Demo / self-check
# ----------------------------------------------------------------------------

def _xla_reference(x, weight, key, p11, p22, pieces):
    """XLA conv on the same masked bf16 pieces, f32 accumulation."""
    xm = build_pieces_masked(x, key, p11, p22, pieces).astype(jnp.bfloat16)
    w_bf = weight.astype(jnp.bfloat16)
    conv = lambda xi: jax.lax.conv_general_dilated(
        xi, w_bf, (1, 1), "VALID",
        dimension_numbers=("NCHW", "OIHW", "NCHW"),
        preferred_element_type=jnp.float32)
    rp = jax.vmap(conv)(xm)                     # (P, N, Cout, li, lj)
    p0, p1 = pieces
    rows = [jnp.concatenate([rp[i * p1 + j] for j in range(p1)], axis=3)
            for i in range(p0)]
    return jnp.concatenate(rows, axis=2)


def _run_case(kx, kw, km, N, Cin, H, W, Cout, pieces, p11, p22):
    x = jax.random.normal(kx, (N, Cin, H, W), dtype=jnp.float32)
    fan_in = Cin * 3 * 3
    bound = 1.0 / np.sqrt(fan_in)
    weight = jax.random.uniform(kw, (Cout, Cin, 3, 3), jnp.float32, -bound, bound)

    fwd = jax.jit(functools.partial(lossy_conv2d_new_forward,
                                    p11=p11, p22=p22, pieces=pieces))
    out = jax.block_until_ready(fwd(x, weight, km))
    assert out.shape == (N, Cout, H, W), out.shape

    ref = _xla_reference(x, weight, km, p11, p22, pieces)
    np.testing.assert_allclose(np.asarray(out.astype(jnp.float32)),
                               np.asarray(ref), rtol=2e-2, atol=2e-2)


if __name__ == "__main__":
    key = jax.random.PRNGKey(0)
    k1, k2, k3, k4, k5, k6 = jax.random.split(key, 6)
    p11, p22 = 0.99, 0.03

    # Case 1: small-Cin path (host-side lane-dense im2col), Cin=4, Cout=8.
    _run_case(k1, k2, k3, N=2, Cin=4, H=16, W=16, Cout=8,
              pieces=(2, 2), p11=p11, p22=p22)

    # Case 2: per-tap accumulating-matmul path, Cin=128, Cout=64 (padded to 128).
    _run_case(k4, k5, k6, N=2, Cin=128, H=8, W=8, Cout=64,
              pieces=(2, 2), p11=p11, p22=p22)

    print("KERNEL_OK")
</pallas_src>

<mosaic_0001>
module attributes {stable_mosaic.version = 11 : i64} {
  func.func @_conv_piece_kernel(%arg0: i32, %arg1: i32, %arg2: memref<1x2x8x8x128xbf16, #tpu.memory_space<vmem>>, %arg3: memref<128x128xbf16, #tpu.memory_space<vmem>>, %arg4: memref<1x2x8x8x128xbf16, #tpu.memory_space<vmem>>) attributes {dimension_semantics = [#tpu.dimension_semantics<parallel>, #tpu.dimension_semantics<parallel>], iteration_bounds = array<i64: 4, 1>, scalar_prefetch = 0 : i64, scratch_operands = 0 : i64, tpu.core_type = #tpu.core_type<tc>, window_params = [{transform_indices = @transform_0, window_bounds = array<i64: 1, 2, 8, 8, 128>}, {pipeline_mode = #tpu.pipeline_mode<synchronous>, transform_indices = @transform_1, window_bounds = array<i64: 128, 128>}, {transform_indices = @transform_2, window_bounds = array<i64: 1, 2, 8, 8, 128>}]} {
    %c0 = arith.constant 0 : index
    %c0_0 = arith.constant 0 : index
    %c0_1 = arith.constant 0 : index
    %c0_2 = arith.constant 0 : index
    %c0_3 = arith.constant 0 : index
    %0 = vector.load %arg2[%c0, %c0_0, %c0_1, %c0_2, %c0_3] : memref<1x2x8x8x128xbf16, #tpu.memory_space<vmem>>, vector<1x2x8x8x128xbf16>
    %1 = vector.shape_cast %0 : vector<1x2x8x8x128xbf16> to vector<2x8x8x128xbf16>
    %2 = vector.shape_cast %1 : vector<2x8x8x128xbf16> to vector<128x128xbf16>
    %c0_4 = arith.constant 0 : index
    %c0_5 = arith.constant 0 : index
    %3 = vector.load %arg3[%c0_4, %c0_5] : memref<128x128xbf16, #tpu.memory_space<vmem>>, vector<128x128xbf16>
    %cst = arith.constant dense<0.000000e+00> : vector<128x128xf32>
    %4 = tpu.matmul %2, %3, %cst {dimension_numbers = #tpu.dot_dimension_numbers<[1], [0], [0], [1], [0, 0, 1, 1], [], []>} : vector<128x128xbf16>, vector<128x128xbf16>, vector<128x128xf32> -> vector<128x128xf32>
    %5 = vector.shape_cast %4 : vector<128x128xf32> to vector<2x8x8x128xf32>
    %6 = arith.truncf %5 : vector<2x8x8x128xf32> to vector<2x8x8x128xbf16>
    %c0_6 = arith.constant 0 : index
    %c0_7 = arith.constant 0 : index
    %c0_8 = arith.constant 0 : index
    %c0_9 = arith.constant 0 : index
    %c0_10 = arith.constant 0 : index
    %7 = vector.load %arg4[%c0_6, %c0_7, %c0_8, %c0_9, %c0_10] : memref<1x2x8x8x128xbf16, #tpu.memory_space<vmem>>, vector<1x2x8x8x128xbf16>
    %8 = vector.shape_cast %7 : vector<1x2x8x8x128xbf16> to vector<2x8x8x128xbf16>
    %9 = vector.shape_cast %6 : vector<2x8x8x128xbf16> to vector<1x2x8x8x128xbf16>
    tpu.vector_store %arg4[%c0_6, %c0_7, %c0_8, %c0_9, %c0_10], %9 {strides = array<i32>} : memref<1x2x8x8x128xbf16, #tpu.memory_space<vmem>>, vector<1x2x8x8x128xbf16>,
    return
  }
  func.func @transform_0(%arg0: i32, %arg1: i32) -> (i32, i32, i32, i32, i32) {
    %c0_i32 = arith.constant 0 : i32
    %c0_i32_0 = arith.constant 0 : i32
    %c0_i32_1 = arith.constant 0 : i32
    %c0_i32_2 = arith.constant 0 : i32
    return %arg0, %arg1, %c0_i32, %c0_i32_0, %c0_i32_1 : i32, i32, i32, i32, i32
  }
  func.func @transform_1(%arg0: i32, %arg1: i32) -> (i32, i32) {
    %c0_i32 = arith.constant 0 : i32
    %c0_i32_0 = arith.constant 0 : i32
    %c0_i32_1 = arith.constant 0 : i32
    return %c0_i32, %c0_i32_0 : i32, i32
  }
  func.func @transform_2(%arg0: i32, %arg1: i32) -> (i32, i32, i32, i32, i32) {
    %c0_i32 = arith.constant 0 : i32
    %c0_i32_0 = arith.constant 0 : i32
    %c0_i32_1 = arith.constant 0 : i32
    %c0_i32_2 = arith.constant 0 : i32
    return %arg0, %arg1, %c0_i32, %c0_i32_0, %c0_i32_1 : i32, i32, i32, i32, i32
  }
}

</mosaic_0001>

<bundles_post_ra>
// kernel: custom-call.1
= control target key start
LH: loop header
LB: loop body
LE: loop exit
PB: predicated region body
PF: predicated region fallthrough
CT: control target
= control target key end

     0   :  { %s6_s0 = inlined_call_operand.vmem [shape: s32[36,32], index: 0, kind: output, shape index: {}]  }

// kernel: custom-call
= control target key start
LH: loop header
LB: loop body
LE: loop exit
PB: predicated region body
PF: predicated region fallthrough
CT: control target
= control target key end

     0   :  { %s6_s0 = inlined_call_operand.vmem [shape: s32[32], index: 0, kind: output, shape index: {}]  }

// kernel: lossy_conv2d_new_forward.1
= control target key start
LH: loop header
LB: loop body
LE: loop exit
PB: predicated region body
PF: predicated region fallthrough
CT: control target
= control target key end

     0   :  { %s761_s9 = smov 0   ;;  %s763_s10 = smov 0   ;;  %s835_s0 = inlined_call_operand.vmem [shape: bf16[4,2,8,8,128], index: 0, kind: input, shape index: {}]   ;;  %s836_s1 = inlined_call_operand.vmem [shape: bf16[128,128], index: 1, kind: input, shape index: {}]   ;;  %s837_s2 = inlined_call_operand.vmem [shape: bf16[4,2,8,8,128], index: 2, kind: output, shape index: {}]  }
   0x1   :  { %s765_s11 = smov 0  }
   0x2 LB: > { %s24_s12 = sadd.s32 1, %s740_s10  ;;  %p546_p0 = scmp.ge.s32.totalorder %s744_s11, 1  ;;  %s744_s11 = sphi %s765_s11, %s12_s11   ;;  %s740_s10 = sphi %s763_s10, %s839_s10   ;;  %s736_s9 = sphi %s761_s9, %s838_s9  }
   0x3   : > { %p26_p1 = scmp.ge.s32.totalorder %s24_s12, 4  ;;  %p134_p2 = scmp.lt.s32.totalorder %s744_s11, 5 }
   0x5   : > { %s841_s12 = smov (%p26_p1, %s24_s12), 0  ;;  %p135_p3 = pnand %p546_p0, %p134_p2 }
   0x6   : > { %v706_v0 = vld [vmem:[%s836_s1] sm:$0xff] (!%p135_p3)   ;;  %p167_p4 = scmp.lt.s32.totalorder (!%p135_p3), %s736_s9, 3  ;;  %v707_v1 = vld [vmem:[%s836_s1 + $0x8] sm:$0xff] (!%p135_p3)   ;;  %v708_v2 = vld [vmem:[%s836_s1 + $0x10] sm:$0xff] (!%p135_p3)  }
   0x7   : > { %138 = sbr.rel (%p135_p3) target bundleno = 265 (0x109), region = 28  ;;  %634 = vmatprep.subr.bf16.mxu0 (!%p135_p3), %v706_v0  ;;  %666 = vmatprep.subr.bf16.mxu1 (!%p135_p3), %v706_v0  ;;  %v709_v3 = vld [vmem:[%s836_s1 + $0x18] sm:$0xff] (!%p135_p3)   ;;  %v710_v6 = vld [vmem:[%s836_s1 + $0x20] sm:$0xff] (!%p135_p3)   ;;  %v711_v7 = vld [vmem:[%s836_s1 + $0x28] sm:$0xff] (!%p135_p3)  }
   0x8   : > { %635 = vmatpush3.bf16.msra.mxu0 (!%p135_p3), %v706_v0  ;;  %674 = vmatpush3.bf16.msra.mxu1 (!%p135_p3), %v706_v0  ;;  %v712_v8 = vld [vmem:[%s836_s1 + $0x30] sm:$0xff] (!%p135_p3)   ;;  %v713_v9 = vld [vmem:[%s836_s1 + $0x38] sm:$0xff] (!%p135_p3)  }
   0x9   : > { %636 = vmatprep.subr.bf16.mxu0 (!%p135_p3), %v707_v1  ;;  %667 = vmatprep.subr.bf16.mxu1 (!%p135_p3), %v707_v1 }
   0xc   : > { %637 = vmatpush3.bf16.msra.mxu0 (!%p135_p3), %v707_v1  ;;  %675 = vmatpush3.bf16.msra.mxu1 (!%p135_p3), %v707_v1 }
   0xd   : > { %638 = vmatprep.subr.bf16.mxu0 (!%p135_p3), %v708_v2  ;;  %668 = vmatprep.subr.bf16.mxu1 (!%p135_p3), %v708_v2 }
   0xe   : > { %s843_s9 = smov (!%p167_p4, %s736_s9), 3 }
   0xf   : > { %s569_s19 = sshll.u32 %s843_s9, 6 }
  0x10   : > { %s796_s22 = scalar_lea.vmem %s835_s0, %s569_s19  ;;  %639 = vmatpush3.bf16.msra.mxu0 %v708_v2  ;;  %676 = vmatpush3.bf16.msra.mxu1 %v708_v2  ;;  %s186_s7 = scalar_lea.vmem %s837_s2, %s569_s19 }
  0x11   : > { %v714_v4 = vld [vmem:[%s796_s22] sm:$0xff]   ;;  %640 = vmatprep.subr.bf16.mxu0 %v709_v3  ;;  %669 = vmatprep.subr.bf16.mxu1 %v709_v3  ;;  %v716_v10 = vld [vmem:[%s796_s22 + $0x8] sm:$0xff]   ;;  %v718_v12 = vld [vmem:[%s796_s22 + $0x10] sm:$0xff]  }
  0x12   : > { %v715_v5 = vld [vmem:[%s796_s22 + $0x20] sm:$0xff]   ;;  %650 = vmatprep.mubr.bf16.mxu0 %v714_v4  ;;  %v717_v11 = vld [vmem:[%s796_s22 + $0x28] sm:$0xff]   ;;  %v719_v13 = vld [vmem:[%s796_s22 + $0x30] sm:$0xff]  }
  0x13   : > { %658 = vmatprep.mubr.bf16.mxu1 %v715_v5  ;;  %v720_v14 = vld [vmem:[%s796_s22 + $0x18] sm:$0xff]  }
  0x14   : > { %641 = vmatpush3.bf16.msra.mxu0 %v709_v3  ;;  %677 = vmatpush3.bf16.msra.mxu1 %v709_v3  ;;  %v721_v15 = vld [vmem:[%s796_s22 + $0x38] sm:$0xff]  }
  0x15   : > { %642 = vmatprep.subr.bf16.mxu0 %v710_v6  ;;  %670 = vmatprep.subr.bf16.mxu1 %v710_v6 }
  0x18   : > { %643 = vmatpush3.bf16.msra.mxu0 %v710_v6  ;;  %678 = vmatpush3.bf16.msra.mxu1 %v710_v6 }
  0x19   : > { %644 = vmatprep.subr.bf16.mxu0 %v711_v7  ;;  %671 = vmatprep.subr.bf16.mxu1 %v711_v7 }
  0x1c   : > { %645 = vmatpush3.bf16.msra.mxu0 %v711_v7  ;;  %679 = vmatpush3.bf16.msra.mxu1 %v711_v7 }
  0x1d   : > { %646 = vmatprep.subr.bf16.mxu0 %v712_v8  ;;  %672 = vmatprep.subr.bf16.mxu1 %v712_v8 }
  0x20   : > { %647 = vmatpush3.bf16.msra.mxu0 %v712_v8  ;;  %680 = vmatpush3.bf16.msra.mxu1 %v712_v8 }
  0x21   : > { %648 = vmatprep.subr.bf16.mxu0 %v713_v9  ;;  %673 = vmatprep.subr.bf16.mxu1 %v713_v9 }
  0x24   : > { %649 = vmatpush3.bf16.msra.mxu0 %v713_v9  ;;  %681 = vmatpush3.bf16.msra.mxu1 %v713_v9 }
  0x27   : > { %651 = vmatmul.mubr.bf16.vlgmr.msra.gmra.mrb[0].mxu0 %v716_v10  ;;  %659 = vmatmul.mubr.bf16.vlgmr.msra.gmra.mrb[0].mxu1 %v717_v11 }
  0x28   : > { %654 = vmatprep.mubr.bf16.mxu0 %v718_v12  ;;  %662 = vmatprep.mubr.bf16.mxu1 %v719_v13 }
  0x2f   : > { %655 = vmatmul.mubr.bf16.gmra.mrb[4].mxu0 %v720_v14  ;;  %663 = vmatmul.mubr.bf16.gmra.mrb[4].mxu1 %v721_v15 }
  0xfa   : > { %v652_v16 = vpop.f32.mrb[0].mxu0  ;;  %v660_v17 = vpop.f32.mrb[0].mxu1 }
  0xfb   : > { %v351_v18 = vpop.f32.mrb[1].mxu0  ;;  %v383_v19 = vpop.f32.mrb[1].mxu1 }
  0xfc   : > { %v653_v20 = vpop.f32.mrb[2].mxu0  ;;  %v661_v21 = vpop.f32.mrb[2].mxu1 }
  0xfd   : > { %v579_v22 = vpack.c.bf16 %v653_v20, %v652_v16  ;;  %v599_v23 = vpack.c.bf16 %v661_v21, %v660_v17  ;;  %v354_v24 = vpop.f32.mrb[3].mxu0  ;;  %v386_v25 = vpop.f32.mrb[3].mxu1 }
  0xfe   : > { %v574_v26 = vpack.c.bf16 %v354_v24, %v351_v18  ;;  %v594_v27 = vpack.c.bf16 %v386_v25, %v383_v19 }
  0xff   : > { %611 = vst [vmem:[%s186_s7 + $0x8] sm:$0xff] %v579_v22   ;;  %615 = vst [vmem:[%s186_s7 + $0x28] sm:$0xff] %v599_v23  }
 0x100   : > { %575 = vst [vmem:[%s186_s7] sm:$0xff] %v574_v26   ;;  %614 = vst [vmem:[%s186_s7 + $0x20] sm:$0xff] %v594_v27  }
 0x102   : > { %v656_v28 = vpop.f32.mrb[4].mxu0  ;;  %v664_v29 = vpop.f32.mrb[4].mxu1 }
 0x103   : > { %v367_v30 = vpop.f32.mrb[5].mxu0  ;;  %v399_v31 = vpop.f32.mrb[5].mxu1 }
 0x104   : > { %v657_v32 = vpop.f32.mrb[6].mxu0  ;;  %v665_v33 = vpop.f32.mrb[6].mxu1 }
 0x105   : > { %v589_v34 = vpack.c.bf16 %v657_v32, %v656_v28  ;;  %v609_v35 = vpack.c.bf16 %v665_v33, %v664_v29  ;;  %v370_v36 = vpop.f32.mrb[7].mxu0  ;;  %v402_v37 = vpop.f32.mrb[7].mxu1 }
 0x106   : > { %v584_v38 = vpack.c.bf16 %v370_v36, %v367_v30  ;;  %v604_v39 = vpack.c.bf16 %v402_v37, %v399_v31 }
 0x107   : > { %613 = vst [vmem:[%s186_s7 + $0x18] sm:$0xff] %v589_v34   ;;  %617 = vst [vmem:[%s186_s7 + $0x38] sm:$0xff] %v609_v35  }
 0x108   : > { %612 = vst [vmem:[%s186_s7 + $0x10] sm:$0xff] %v584_v38   ;;  %616 = vst [vmem:[%s186_s7 + $0x30] sm:$0xff] %v604_v39  }
 0x109 PF: > { %s12_s11 = sadd.s32 1, %s744_s11   ;;  %s838_s9 = smov %s740_s10 }
 0x10a   : > { %p9_p5 = scmp.ge.s32.totalorder %s12_s11, 6   ;;  %s839_s10 = smov %s841_s12 }
 0x10c   :  { %11 = sbr.rel (!%p9_p5) target bundleno = 2 (0x2), region = 58 }

</bundles_post_ra>
